<compile_context>
chip_gen: v5e
topology: v5e:2x2
jax: 0.10.0
libtpu: 0.0.40
codegen_flags: <defaults>
</compile_context>

<pallas_src>
import jax
import jax.numpy as jnp
from jax.experimental import pallas as pl
from jax.experimental.pallas import tpu as pltpu


def _drop_path_kernel(scale_ref, x_ref, o_ref):
    # scale_ref: (TB, 1) f32 VMEM block  — mask[b] / keep_prob per sample
    # x_ref / o_ref: (TB, TN) VMEM blocks of the flattened (B, Np) input
    s = scale_ref[...]                            # (TB, 1) f32
    x = x_ref[...].astype(jnp.float32)
    o_ref[...] = (x * s).astype(o_ref.dtype)


def _round_down(v, m):
    return (v // m) * m


def _choose_tiles(B, N, itemsize, target_bytes):
    """Pick (tb, tn) blocks of <= target_bytes. N must be a multiple of 128."""
    sub = max(8, 32 // itemsize)          # dtype-aware sublane multiple
    target_elems = max(128 * sub, target_bytes // itemsize)

    # Lane tile: multiple of 128, leaving room for at least `sub` rows.
    tn = min(N, max(128, _round_down(target_elems // sub, 128)))

    rows = max(1, target_elems // tn)
    if rows >= B:
        tb = B                             # full batch dim (always legal)
    else:
        tb = min(B, max(sub, _round_down(rows, sub)))

    # Strict budget enforcement (guards against rounding surprises).
    while tb * tn * itemsize > target_bytes and tn > 128:
        tn = max(128, _round_down(tn // 2, 128))
    while tb * tn * itemsize > target_bytes and tb > sub:
        tb = max(sub, _round_down(tb // 2, sub))

    # Guarantee >= 2 blocks along a parallel axis so both v7x TCs get work.
    if pl.cdiv(B, tb) * pl.cdiv(N, tn) < 2:
        if N >= 256:
            tn = max(128, _round_down(N // 2, 128))
        elif B >= 2 * sub:
            tb = max(sub, _round_down(B // 2, sub))
        # else: the tensor is tiny; a single block is fine.
    return tb, tn


def drop_path(x, drop_prob, key, training=True, *,
              target_block_bytes=4 * 1024 * 1024,
              min_kernel_bytes=1 << 20,
              donate=False):
    """Stochastic depth, matching the PyTorch DropPath.forward semantics."""
    if drop_prob is None or drop_prob == 0.0 or not training:
        return x

    orig_shape = x.shape
    B = int(orig_shape[0])
    N = 1
    for d in orig_shape[1:]:
        N *= int(d)

    keep_prob = 1.0 - float(drop_prob)
    # Same mask construction as the torch code: floor(keep_prob + U[0,1)).
    # Note: drop_prob == 1.0 -> keep_prob == 0 -> NaNs, identical to torch.
    rand = jax.random.uniform(key, (B,), dtype=jnp.float32)
    mask = jnp.floor(keep_prob + rand)
    scale = (mask / keep_prob).astype(jnp.float32)

    itemsize = jnp.dtype(x.dtype).itemsize
    if B * N * itemsize < min_kernel_bytes:
        # Tiny tensor: a fused XLA elementwise op beats a custom-call dispatch.
        bshape = (B,) + (1,) * (x.ndim - 1)
        return (x.astype(jnp.float32) * scale.reshape(bshape)).astype(x.dtype)

    # Lane-dense 2D view; pad the lane axis to a multiple of 128 so every
    # store is an unmasked full-lane vst.
    Np = ((N + 127) // 128) * 128
    x2 = x.reshape(B, N)
    if Np != N:
        x2 = jnp.pad(x2, ((0, 0), (0, Np - N)))

    tb, tn = _choose_tiles(B, Np, itemsize, target_block_bytes)
    grid = (pl.cdiv(B, tb), pl.cdiv(Np, tn))

    # Footprint-derived VMEM limit: double-buffered x, out, scale + slack.
    blk_bytes = tb * tn * itemsize
    vmem_limit = int(4 * blk_bytes + 2 * tb * 4 + (2 << 20))
    vmem_limit = min(max(vmem_limit, 4 << 20), 28 << 20)

    scale2 = scale.reshape(B, 1)

    out = pl.pallas_call(
        _drop_path_kernel,
        out_shape=jax.ShapeDtypeStruct((B, Np), x.dtype),
        grid_spec=pltpu.PrefetchScalarGridSpec(
            num_scalar_prefetch=0,
            grid=grid,
            in_specs=[
                pl.BlockSpec((tb, 1), lambda i, j: (i, 0)),    # per-sample scale
                pl.BlockSpec((tb, tn), lambda i, j: (i, j)),   # x
            ],
            out_specs=pl.BlockSpec((tb, tn), lambda i, j: (i, j)),
        ),
        compiler_params=pltpu.CompilerParams(
            dimension_semantics=("parallel", "parallel"),
            vmem_limit_bytes=vmem_limit,
        ),
        cost_estimate=pl.CostEstimate(
            flops=B * Np,
            bytes_accessed=2 * B * Np * itemsize + 4 * B,
            transcendentals=0,
        ),
        input_output_aliases=({1: 0} if donate else {}),
    )(scale2, x2)

    if Np != N:
        out = out[:, :N]
    return out.reshape(orig_shape)


def _reference(x, drop_prob, key):
    """Plain-JAX reference with the same mask construction as the kernel."""
    keep_prob = 1.0 - drop_prob
    B = x.shape[0]
    rand = jax.random.uniform(key, (B,), dtype=jnp.float32)
    mask = jnp.floor(keep_prob + rand)
    bshape = (B,) + (1,) * (x.ndim - 1)
    ref = x.astype(jnp.float32) / keep_prob * mask.reshape(bshape)
    return ref.astype(x.dtype)


if __name__ == "__main__":
    key = jax.random.PRNGKey(0)
    kx, kdrop = jax.random.split(key)
    drop_prob = 0.25

    # 1) f32, N multiple of 128, kernel path forced (exercises grid=(1,2)).
    x = jax.random.normal(kx, (2, 4, 16, 16), dtype=jnp.float32)
    y = jax.block_until_ready(drop_path(x, drop_prob, kdrop, training=True,
                                        min_kernel_bytes=0))
    assert jnp.allclose(y, _reference(x, drop_prob, kdrop),
                        atol=1e-6, rtol=1e-6), "f32 mismatch"

    # 2) f32, odd N (189) -> pad-to-128 path.
    x_odd = jax.random.normal(kx, (2, 3, 7, 9), dtype=jnp.float32)
    y_odd = jax.block_until_ready(drop_path(x_odd, drop_prob, kdrop,
                                            training=True, min_kernel_bytes=0))
    assert jnp.allclose(y_odd, _reference(x_odd, drop_prob, kdrop),
                        atol=1e-6, rtol=1e-6), "odd-N mismatch"

    # 3) bf16 input through the kernel.
    x_bf = x.astype(jnp.bfloat16)
    y_bf = jax.block_until_ready(drop_path(x_bf, drop_prob, kdrop,
                                           training=True, min_kernel_bytes=0))
    assert jnp.allclose(y_bf.astype(jnp.float32),
                        _reference(x_bf, drop_prob, kdrop).astype(jnp.float32),
                        atol=1e-2, rtol=1e-2), "bf16 mismatch"

    # 4) Identity paths (eval mode / drop_prob == 0), as in the torch module.
    assert jnp.array_equal(drop_path(x, drop_prob, kdrop, training=False), x)
    assert jnp.array_equal(drop_path(x, 0.0, kdrop, training=True), x)

    # 5) Tiny-tensor bypass (default threshold) matches the reference too.
    y_small = jax.block_until_ready(drop_path(x, drop_prob, kdrop, training=True))
    assert jnp.allclose(y_small, _reference(x, drop_prob, kdrop),
                        atol=1e-6, rtol=1e-6), "bypass mismatch"

    print("KERNEL_OK")
</pallas_src>

<mosaic_0001>
module attributes {stable_mosaic.version = 11 : i64} {
  func.func @_drop_path_kernel(%arg0: i32, %arg1: i32, %arg2: memref<2x1xf32, #tpu.memory_space<vmem>>, %arg3: memref<2x512xf32, #tpu.memory_space<vmem>>, %arg4: memref<2x512xf32, #tpu.memory_space<vmem>>) attributes {dimension_semantics = [#tpu.dimension_semantics<parallel>, #tpu.dimension_semantics<parallel>], iteration_bounds = array<i64: 1, 2>, scalar_prefetch = 0 : i64, scratch_operands = 0 : i64, tpu.core_type = #tpu.core_type<tc>, window_params = [{transform_indices = @transform_0, window_bounds = array<i64: 2, 1>}, {transform_indices = @transform_1, window_bounds = array<i64: 2, 512>}, {transform_indices = @transform_2, window_bounds = array<i64: 2, 512>}]} {
    %c0 = arith.constant 0 : index
    %c0_0 = arith.constant 0 : index
    %0 = vector.load %arg2[%c0, %c0_0] : memref<2x1xf32, #tpu.memory_space<vmem>>, vector<2x1xf32>
    %c0_1 = arith.constant 0 : index
    %c0_2 = arith.constant 0 : index
    %1 = vector.load %arg3[%c0_1, %c0_2] : memref<2x512xf32, #tpu.memory_space<vmem>>, vector<2x512xf32>
    %2 = vector.broadcast %0 : vector<2x1xf32> to vector<2x512xf32>
    %3 = arith.mulf %1, %2 : vector<2x512xf32>
    %c0_3 = arith.constant 0 : index
    %c0_4 = arith.constant 0 : index
    %4 = vector.load %arg4[%c0_3, %c0_4] : memref<2x512xf32, #tpu.memory_space<vmem>>, vector<2x512xf32>
    tpu.vector_store %arg4[%c0_3, %c0_4], %3 {strides = array<i32>} : memref<2x512xf32, #tpu.memory_space<vmem>>, vector<2x512xf32>,
    return
  }
  func.func @transform_0(%arg0: i32, %arg1: i32) -> (i32, i32) {
    %c0_i32 = arith.constant 0 : i32
    %c0_i32_0 = arith.constant 0 : i32
    return %arg0, %c0_i32 : i32, i32
  }
  func.func @transform_1(%arg0: i32, %arg1: i32) -> (i32, i32) {
    %c0_i32 = arith.constant 0 : i32
    return %arg0, %arg1 : i32, i32
  }
  func.func @transform_2(%arg0: i32, %arg1: i32) -> (i32, i32) {
    %c0_i32 = arith.constant 0 : i32
    return %arg0, %arg1 : i32, i32
  }
}

</mosaic_0001>

<bundles_post_ra>
// kernel: tpu_custom_call.1
= control target key start
LH: loop header
LB: loop body
LE: loop exit
PB: predicated region body
PF: predicated region fallthrough
CT: control target
= control target key end

     0   :  { %7 = vsyncpa [#allocation3], 0  ;;  %s667_s0 = inlined_call_operand.vmem [shape: f32[2,1], index: 0, kind: input, shape index: {}]   ;;  %s668_s1 = inlined_call_operand.hbm [shape: f32[2,1024], index: 1, kind: input, shape index: {}]   ;;  %s669_s2 = inlined_call_operand.hbm [shape: f32[2,1024], index: 2, kind: output, shape index: {}]  }
   0x1   :  { %9 = vsyncpa [#allocation3 + $0x1], 0 }
   0x2   :  { %10 = vsyncpa [#allocation4], 0 }
   0x3   :  { %12 = vsyncpa [#allocation4 + $0x1], 0  ;;  %s544_s9 = smov 0   ;;  %s546_s10 = smov 0  }
   0x4   :  { %s548_s11 = smov 0   ;;  %s550_s12 = smov 0  }
   0x5   :  { %s552_s13 = smov 0   ;;  %s554_s14 = smov 0  }
   0x6 LB: > { %s330_s15 = sadd.s32 4294967295, %s525_s14   ;;  %s331_s16 = sadd.s32 4294967294, %s525_s14   ;;  %s525_s14 = sphi %s554_s14, %s18_s14   ;;  %s521_s13 = sphi %s552_s13, %s678_s13   ;;  %s517_s12 = sphi %s550_s12, %s677_s12   ;;  %s513_s11 = sphi %s548_s11, %s676_s11   ;;  %s509_s10 = sphi %s546_s10, %s675_s10   ;;  %s505_s9 = sphi %s544_s9, %s674_s9  }
   0x7   : > { %s27_s17 = sadd.s32 1, %s521_s13  ;;  %s65_s18 = sadd.s32 1, %s513_s11 }
   0x8   : > { %p28_p0 = scmp.ge.s32.totalorder %s27_s17, 2  ;;  %p72_p1 = scmp.ne.s32.totalorder %s513_s11, %s509_s10 }
   0x9   : > { %p73_p2 = scmp.eq.s32.totalorder %s525_s14, 0  ;;  %p78_p3 = scmp.ne.s32.totalorder %s509_s10, %s505_s9 }
   0xa   : > { %s680_s17 = smov (%p28_p0, %s27_s17), 0  ;;  %p79_p5 = scmp.eq.s32.totalorder %s330_s15, 0 }
   0xb   : > { %p585_p4 = por %p73_p2, %p72_p1  ;;  %s61_s20 = ssub.s32 %s521_s13, %s680_s17 }
   0xc   : > { %p104_p6 = scmp.eq.s32.totalorder %s330_s15, 1  ;;  %p63_p7 = scmp.eq.s32.totalorder %s61_s20, 0 }
   0xd   : > { %p591_p8 = por %p79_p5, %p78_p3  ;;  %p110_p10 = scmp.eq.s32.totalorder %s331_s16, 1 }
   0xe   : > { %p595_p9 = por %p104_p6, %p72_p1  ;;  %p334_p12 = scmp.ge.s32.totalorder %s525_s14, 2 }
   0xf   : > { %s600_s23 = scalar_select %p63_p7, %s513_s11, %s65_s18  }
  0x10   : > { %p602_p11 = por %p110_p10, %p78_p3  ;;  %p360_p13 = scmp.lt.s32.totalorder %s525_s14, 2 }
  0x11   : > { %s137_s25 = sand.u32 1, %s513_s11   ;;  %s346_s27 = sshll.u32 %s521_s13, 3 }
  0x12   : > { %s335_s26 = sshll.u32 %s137_s25, 3  ;;  %s148_s30 = scalar_lea.hbm %s668_s1, %s346_s27 }
  0x13   : > { %s141_s3 = scalar_lea.vmem [#allocation2], %s335_s26  ;;  %s150_s5 = sshll.u32 %s148_s30, 4  ;;  %s151_s5 = int_to_ptr.hbm [resolvable:$true] %s150_s5 }
  0x14   : > { %s152_s4 = sshll.u32 %s141_s3, 4  ;;  %p353_p0 = pnand %p360_p13, %p585_p4  ;;  %s153_s4 = int_to_ptr.vmem [resolvable:$true] %s152_s4 }
  0x15   : > { %p338_p1 = scmp.ge.s32.totalorder %s525_s14, 1  ;;  %p157_p2 = scmp.lt.s32.totalorder %s525_s14, 3 }
  0x16   : > { %s138_s6 = scalar_lea.sflag [#allocation3], %s137_s25 }
  0x17   : > { %355 = dma.hbm_to_vmem [thread:$0]  (!%p353_p0), %s151_s5, 128, %s153_s4, %s138_s6  }
  0x18   : > { %p158_p3 = pnand %p338_p1, %p157_p2 }
  0x19   : > { %s618_s7 = sand.u32 (!%p158_p3), 1, %s509_s10  }
  0x1a   : > { %161 = sbr.rel (%p158_p3) target bundleno = 156 (0x9c), region = 28  ;;  %s339_s8 = sshll.u32 (!%p158_p3), %s618_s7, 3 }
  0x1b   : > { %s164_s15 = scalar_lea.sflag (!%p158_p3), [#allocation3], %s618_s7  ;;  %s167_s16 = scalar_lea.vmem (!%p158_p3), [#allocation2], %s339_s8 }
  0x1f   : > { %496 = dma.done.wait (%p591_p8), %s164_s15, 128  }
  0x20   : > { %498 = vsyncadd (%p591_p8), %s164_s15, 4294967168  ;;  %v527_v0 = vmov 0   ;;  %v199_v1 = vld [vmem:[%s667_s0] sm:$0x3]  ;;  %v528_v2 = vmov 269488144  }
  0x21   : > { %412 = vset.pattern.permute.xlu0 %v527_v0  ;;  %v206_v3 = vunpack.c.l.s4 %v528_v2  ;;  %s347_s20 = sshll.u32 %s517_s12, 3  ;;  %v200_v5 = vld [vmem:[%s167_s16] sm:$0xff]  ;;  %s192_s21 = scalar_lea.vmem [#allocation5], %s339_s8 }
  0x22   : > { %203 = vperm.xlu0 %412, %v199_v1   ;;  %s226_s27 = scalar_lea.hbm %s669_s2, %s347_s20  ;;  %s228_s28 = sshll.u32 %s192_s21, 4  ;;  %s229_s28 = int_to_ptr.vmem [resolvable:$true] %s228_s28 }
  0x23   : > { %v207_v4 = vunpack.c.0.s8 %v206_v3  ;;  %s230_s29 = sshll.u32 %s226_s27, 4  ;;  %s213_s30 = scalar_lea.sflag [#allocation4], %s618_s7  ;;  %s231_s29 = int_to_ptr.hbm [resolvable:$true] %s230_s29 }
  0x24   : > { %s457_s3 = sshra.s32 %s231_s29, 4  ;;  %s463_s6 = scalar_lea.hbm %s669_s2, 16  ;;  %s458_s3 = int_to_ptr.hbm [resolvable:$true] %s457_s3 }
  0x25   : > { %s459_s12 = scalar_lea.hbm %s458_s3, 8  ;;  %p464_p7 = scmp.lt.s32.totalorder %s458_s3, %s669_s2 }
  0x26   : > { %p460_p4 = scmp.ne.s32.totalorder %s458_s3, %s459_s12  ;;  %p465_p8 = scmp.lt.s32.totalorder %s463_s6, %s459_s12 }
  0x28   : > { %p461_p5 = pnand %p460_p4, %p595_p9  ;;  %p466_p10 = por %p465_p8, %p464_p7 }
  0x2a   : > { %p462_p6 = pneg %p461_p5 }
  0x2c   : > { %p467_p13 = pnand %p466_p10, %p462_p6 }
  0x94   : > { %v204_v6 = vpop.permute.xlu0 %203 }
  0x95   : > { %v208_v7 = vperm.slane %v204_v6, %v207_v4 }
  0x97   : > { %v210_v8 = vmul.f32 %v208_v7, %v200_v5 }
  0x99   : > { %211 = vst [vmem:[%s192_s21] sm:$0xff] %v210_v8 }
  0x9a   : > { %470 = shalt.err (!%p467_p13)
}
  0x9b   : > { %350 = dma.vmem_to_hbm [thread:$0]  (%p595_p9), %s229_s28, 128, %s231_s29, %s213_s30  }
  0x9c PF: > { %s242_s7 = sand.u32 1, %s505_s9   ;;  %p357_p0 = pnand %p334_p12, %p602_p11 }
  0x9d   : > { %s243_s16 = scalar_lea.sflag [#allocation4], %s242_s7 }
  0x9e   : > { %p358_p1 = pneg %p357_p0 }
  0xa0   : > { %500 = dma.done.wait (%p358_p1), %s243_s16, 128  }
  0xa1   : > { %502 = vsyncadd (%p358_p1), %s243_s16, 4294967168  ;;  %s18_s14 = sadd.s32 1, %s525_s14   ;;  %s674_s9 = smov %s509_s10 }
  0xa2   : > { %p15_p2 = scmp.ge.s32.totalorder %s18_s14, 4   ;;  %s675_s10 = smov %s513_s11 }
  0xa3   : > { %s676_s11 = smov %s600_s23  ;;  %s677_s12 = smov %s521_s13 }
  0xa4   : > { %s678_s13 = smov %s680_s17  ;;  %17 = sbr.rel (!%p15_p2) target bundleno = 6 (0x6), region = 76 }
  0xa9   :  { %249 = vsyncpa [#allocation3], 1 }
  0xaa   :  { %251 = vsyncpa [#allocation3 + $0x1], 1 }
  0xab   :  { %252 = vsyncpa [#allocation4], 1 }
  0xac   :  { %254 = vsyncpa [#allocation4 + $0x1], 1 }

</bundles_post_ra>
